<compile_context>
chip_gen: v7x
topology: tpu7x:2x2x1
jax: 0.10.0
libtpu: 0.0.40
codegen_flags: <defaults>
</compile_context>

<pallas_src>
import functools

import jax
import jax.numpy as jnp
from jax import lax
from jax.experimental import pallas as pl
from jax.experimental.pallas import tpu as pltpu


def _ordinal_loss_kernel(pred_ref, tgt_ref, out_ref, *, lambda_ord, batch_size, tile_b):
    """Per-tile fused CE + ordinal-penalty, one row of loss per batch element.

    pred_ref: (TILE_B, C) logits (native dtype, cast to f32 here)
    tgt_ref : (TILE_B, 1) int32 target class indices
    out_ref : (TILE_B, 1) f32 per-row loss (ce + lambda * penalty)
    """
    logits = pred_ref[...].astype(jnp.float32)                  # (TB, C)
    tgt = tgt_ref[...]                                          # (TB, 1) int32
    TB, C = logits.shape

    needs_mask = (batch_size % tile_b) != 0                     # static Python bool
    if needs_mask:
        row = pl.program_id(0) * tile_b + lax.broadcasted_iota(jnp.int32, (TB, 1), 0)
        valid = row < batch_size                                # (TB, 1) bool
        logits = jnp.where(valid, logits, 0.0)                  # keep padded rows finite
        tgt = jnp.where(valid, tgt, 0)

    # Fused one-hot + ordinal distance from a single integer difference.
    col = lax.broadcasted_iota(jnp.int32, (TB, C), 1)           # class index per column
    dist_i = col - tgt                                          # (TB, C) int32
    onehot = dist_i == 0                                        # (TB, C) bool
    dist = dist_i.astype(jnp.float32)                           # (TB, C)

    # Numerically stable row-wise softmax pieces (probs never materialized).
    m = jnp.max(logits, axis=-1, keepdims=True)                 # (TB, 1)
    e = jnp.exp(logits - m)                                     # (TB, C)
    s = jnp.sum(e, axis=-1, keepdims=True)                      # (TB, 1)
    inv_s = pl.reciprocal(s, approx=False)                      # exact: keeps 1e-5 tol
    log_z = m + jnp.log(s)                                      # (TB, 1)

    # Cross-entropy per row (nn.CrossEntropyLoss, pre-mean).
    tgt_logit = jnp.sum(jnp.where(onehot, logits, 0.0), axis=-1, keepdims=True)
    ce_row = log_z - tgt_logit                                  # (TB, 1)

    # Ordinal penalty per row: sum_j softmax_j * (j - t)^2 = (sum_j e_j * d^2) / s.
    pen_row = jnp.sum(e * dist * dist, axis=-1, keepdims=True) * inv_s

    loss_row = ce_row + lambda_ord * pen_row                    # (TB, 1)
    if needs_mask:
        loss_row = jnp.where(valid, loss_row, 0.0)
    out_ref[...] = loss_row


def ordinal_loss(predictions, targets, lambda_ord=1.0, tile_b=512):
    """Pallas implementation of OrdinalLoss.forward.

    predictions: (B, C) float logits (any float dtype; cast happens in-kernel)
    targets    : (B,)   int class indices in [0, C)
    returns scalar float32 loss = CE(mean) + lambda_ord * mean(sum_j p_ij * (j - t_i)^2)
    """
    B, C = predictions.shape
    tgt2d = targets.astype(jnp.int32).reshape(B, 1)

    # Tile choice: whole batch if it fits comfortably, else a multiple-of-8 tile.
    tb = B if B <= tile_b else tile_b
    num_tiles = pl.cdiv(B, tb)

    kernel = functools.partial(
        _ordinal_loss_kernel,
        lambda_ord=float(lambda_ord),
        batch_size=B,
        tile_b=tb,
    )

    pred_itemsize = jnp.dtype(predictions.dtype).itemsize
    # Explicit VMEM budget: double-buffered inputs/outputs + f32 temporaries headroom.
    vmem_bytes = (2 * tb * C * pred_itemsize      # predictions (2 buffers)
                  + 2 * tb * 4                    # targets     (2 buffers)
                  + 2 * tb * 4                    # output      (2 buffers)
                  + 8 * tb * C * 4)               # live f32 temporaries
    vmem_limit = int(min(32 * 1024 * 1024, max(2 * 1024 * 1024, 2 * vmem_bytes)))

    cost = pl.CostEstimate(
        flops=8 * B * C,
        transcendentals=B * C + B,                # exp per element + log per row
        bytes_accessed=B * C * pred_itemsize + B * 4 + B * 4,
    )

    per_row = pl.pallas_call(
        kernel,
        out_shape=jax.ShapeDtypeStruct((B, 1), jnp.float32),
        grid_spec=pltpu.PrefetchScalarGridSpec(
            num_scalar_prefetch=0,
            grid=(num_tiles,),
            in_specs=[
                pl.BlockSpec((tb, C), lambda i: (i, 0)),
                pl.BlockSpec((tb, 1), lambda i: (i, 0)),
            ],
            out_specs=pl.BlockSpec((tb, 1), lambda i: (i, 0)),
        ),
        compiler_params=pltpu.CompilerParams(
            dimension_semantics=("parallel",),
            vmem_limit_bytes=vmem_limit,
        ),
        cost_estimate=cost,
    )(predictions, tgt2d)

    # Final mean reduction over the batch (tiny, done by XLA in the wrapper).
    return jnp.mean(per_row)


def _reference_loss(predictions, targets, lambda_ord=1.0):
    """Pure-JAX reference mirroring the PyTorch semantics."""
    predictions = predictions.astype(jnp.float32)
    log_z = jax.nn.logsumexp(predictions, axis=-1)
    tgt_logit = jnp.take_along_axis(predictions, targets[:, None], axis=-1)[:, 0]
    ce = jnp.mean(log_z - tgt_logit)
    probs = jax.nn.softmax(predictions, axis=-1)
    j = jnp.arange(predictions.shape[1])[None, :]
    dist2 = (j - targets[:, None]).astype(jnp.float32) ** 2
    pen = jnp.mean(jnp.sum(probs * dist2, axis=-1))
    return ce + lambda_ord * pen


if __name__ == "__main__":
    # class_to_ordinal_map only defines the number/order of classes; use 8 ordinal
    # classes and lambda_ord = 1.0 (deterministic, in-script setup).
    num_classes = 8
    lambda_ord = 1.0
    key = jax.random.PRNGKey(0)

    # Case 1: small batch, single tile.
    batch = 8
    k1, k2, k3, k4 = jax.random.split(key, 4)
    predictions = jax.random.normal(k1, (batch, num_classes), dtype=jnp.float32)
    targets = jax.random.randint(k2, (batch,), 0, num_classes, dtype=jnp.int32)

    loss = jax.block_until_ready(ordinal_loss(predictions, targets, lambda_ord))
    ref = _reference_loss(predictions, targets, lambda_ord)
    assert jnp.allclose(loss, ref, rtol=1e-5, atol=1e-5), (loss, ref)

    # Case 2: multi-tile grid with a padded last tile (exercises masking + pipeline).
    batch2 = 20
    predictions2 = jax.random.normal(k3, (batch2, num_classes), dtype=jnp.float32)
    targets2 = jax.random.randint(k4, (batch2,), 0, num_classes, dtype=jnp.int32)

    loss2 = jax.block_until_ready(ordinal_loss(predictions2, targets2, lambda_ord, tile_b=8))
    ref2 = _reference_loss(predictions2, targets2, lambda_ord)
    assert jnp.allclose(loss2, ref2, rtol=1e-5, atol=1e-5), (loss2, ref2)

    print("KERNEL_OK")
</pallas_src>

<mosaic_0001>
module attributes {stable_mosaic.version = 11 : i64} {
  func.func @_ordinal_loss_kernel(%arg0: i32, %arg1: memref<8x8xf32, #tpu.memory_space<vmem>>, %arg2: memref<8x1xi32, #tpu.memory_space<vmem>>, %arg3: memref<8x1xf32, #tpu.memory_space<vmem>>) attributes {dimension_semantics = [#tpu.dimension_semantics<parallel>], iteration_bounds = array<i64: 1>, scalar_prefetch = 0 : i64, scratch_operands = 0 : i64, tpu.core_type = #tpu.core_type<tc>, window_params = [{transform_indices = @transform_0, window_bounds = array<i64: 8, 8>}, {transform_indices = @transform_1, window_bounds = array<i64: 8, 1>}, {transform_indices = @transform_2, window_bounds = array<i64: 8, 1>}]} {
    %c0 = arith.constant 0 : index
    %c0_0 = arith.constant 0 : index
    %0 = vector.load %arg1[%c0, %c0_0] : memref<8x8xf32, #tpu.memory_space<vmem>>, vector<8x8xf32>
    %c0_1 = arith.constant 0 : index
    %c0_2 = arith.constant 0 : index
    %1 = vector.load %arg2[%c0_1, %c0_2] : memref<8x1xi32, #tpu.memory_space<vmem>>, vector<8x1xi32>
    %2 = tpu.iota {dimensions = array<i32: 1>} : vector<8x8xi32>
    %3 = vector.broadcast %1 : vector<8x1xi32> to vector<8x8xi32>
    %4 = arith.subi %2, %3 : vector<8x8xi32>
    %c0_i32 = arith.constant 0 : i32
    %5 = vector.broadcast %c0_i32 : i32 to vector<8x8xi32>
    %6 = arith.cmpi eq, %4, %5 : vector<8x8xi32>
    %7 = arith.sitofp %4 : vector<8x8xi32> to vector<8x8xf32>
    %cst = arith.constant dense<0xFF800000> : vector<8xf32>
    %8 = vector.multi_reduction <maximumf>, %0, %cst [1] : vector<8x8xf32> to vector<8xf32>
    %9 = vector.shape_cast %8 : vector<8xf32> to vector<8x1xf32>
    %10 = vector.broadcast %9 : vector<8x1xf32> to vector<8x8xf32>
    %11 = arith.subf %0, %10 : vector<8x8xf32>
    %12 = math.exp %11 : vector<8x8xf32>
    %cst_3 = arith.constant dense<0.000000e+00> : vector<8xf32>
    %13 = vector.multi_reduction <add>, %12, %cst_3 [1] : vector<8x8xf32> to vector<8xf32>
    %14 = vector.shape_cast %13 : vector<8xf32> to vector<8x1xf32>
    %15 = tpu.reciprocal %14 : vector<8x1xf32> -> vector<8x1xf32>
    %16 = math.log %14 : vector<8x1xf32>
    %17 = arith.addf %9, %16 : vector<8x1xf32>
    %cst_4 = arith.constant 0.000000e+00 : f32
    %18 = vector.broadcast %cst_4 : f32 to vector<8x8xf32>
    %19 = arith.select %6, %0, %18 : vector<8x8xi1>, vector<8x8xf32>
    %cst_5 = arith.constant dense<0.000000e+00> : vector<8xf32>
    %20 = vector.multi_reduction <add>, %19, %cst_5 [1] : vector<8x8xf32> to vector<8xf32>
    %21 = vector.shape_cast %20 : vector<8xf32> to vector<8x1xf32>
    %22 = arith.subf %17, %21 : vector<8x1xf32>
    %23 = arith.mulf %12, %7 : vector<8x8xf32>
    %24 = arith.mulf %23, %7 : vector<8x8xf32>
    %cst_6 = arith.constant dense<0.000000e+00> : vector<8xf32>
    %25 = vector.multi_reduction <add>, %24, %cst_6 [1] : vector<8x8xf32> to vector<8xf32>
    %26 = vector.shape_cast %25 : vector<8xf32> to vector<8x1xf32>
    %27 = arith.mulf %26, %15 : vector<8x1xf32>
    %cst_7 = arith.constant 1.000000e+00 : f32
    %28 = vector.broadcast %cst_7 : f32 to vector<8x1xf32>
    %29 = arith.mulf %28, %27 : vector<8x1xf32>
    %30 = arith.addf %22, %29 : vector<8x1xf32>
    %c0_8 = arith.constant 0 : index
    %c0_9 = arith.constant 0 : index
    %31 = vector.load %arg3[%c0_8, %c0_9] : memref<8x1xf32, #tpu.memory_space<vmem>>, vector<8x1xf32>
    tpu.vector_store %arg3[%c0_8, %c0_9], %30 {strides = array<i32>} : memref<8x1xf32, #tpu.memory_space<vmem>>, vector<8x1xf32>,
    return
  }
  func.func @transform_0(%arg0: i32) -> (i32, i32) {
    %c0_i32 = arith.constant 0 : i32
    %c0_i32_0 = arith.constant 0 : i32
    return %arg0, %c0_i32 : i32, i32
  }
  func.func @transform_1(%arg0: i32) -> (i32, i32) {
    %c0_i32 = arith.constant 0 : i32
    %c0_i32_0 = arith.constant 0 : i32
    return %arg0, %c0_i32 : i32, i32
  }
  func.func @transform_2(%arg0: i32) -> (i32, i32) {
    %c0_i32 = arith.constant 0 : i32
    %c0_i32_0 = arith.constant 0 : i32
    return %arg0, %c0_i32 : i32, i32
  }
}

</mosaic_0001>

<bundles_post_ra>
// kernel: tpu_custom_call.1
= control target key start
LH: loop header
LB: loop body
LE: loop exit
PB: predicated region body
PF: predicated region fallthrough
CT: control target
= control target key end

     0   :  { %vm21_vm0 = vcmask 64512   ;;  %v61_v1 = vmov 0   ;;  %v13_v6 = vlaneseq  ;;  %vm47_vm2 = vcmask 7168   ;;  %s90_s0 = inlined_call_operand.vmem [shape: f32[8,8], index: 0, kind: input, shape index: {}]   ;;  %s91_s1 = inlined_call_operand.vmem [shape: s32[8,1], index: 1, kind: input, shape index: {}]   ;;  %s92_s2 = inlined_call_operand.vmem [shape: f32[8,1], index: 2, kind: output, shape index: {}]  }
   0x1   :  { %v11_v0 = vld [vmem:[%s90_s0] sm:$0xff]  ;;  %54 = vset.pattern.permute.xlu0 %v61_v1 }
   0x2   :  { %v22_v2 = vsel %vm21_vm0, %v11_v0, -inf  ;;  %v12_v3 = vld [vmem:[%s91_s1] sm:$0xff]  ;;  %v14_v8 = vand.u32 127, %v13_v6 }
   0x3   :  { %23 = vmax.xlane.f32.xlu0 %v22_v2 }
  0x19   :  { %16 = vperm.xlu0 %54, %v12_v3  }
  0x90   :  { %v24_v4 = vpop.xlane.xlu0 %23 }
  0x91   :  { %v25_v5 = vsub.f32 %v11_v0, %v24_v4 }
  0x93   :  { %v26_v7 = vmul.f32 1.442695, %v25_v5 }
  0x95   :  { %55 = vpow2.f32 %v26_v7 }
  0x98   :  { %v17_v9 = vpop.permute.xlu0 %16 }
  0x99   :  { %v18_v10 = vsub.s32 %v14_v8, %v17_v9 }
  0x9b   :  { %v20_v11 = vcvt.s32.f32 %v18_v10  ;;  %vm19_vm1 = vcmp.eq.s32.totalorder %v18_v10, 0 }
  0x9c   :  { %v35_v13 = vsel %vm19_vm1, %v11_v0, 0.0 }
  0x9d   :  { %v36_v16 = vsel %vm21_vm0, %v35_v13, 0.0 }
  0x9f   :  { %v56_v12 = vpop.eup %55 }
  0xa0   :  { %v28_v14 = vsel %vm21_vm0, %v56_v12, 0.0  ;;  %v40_v15 = vmul.f32 %v56_v12, %v20_v11 }
  0xa1   :  { %29 = vadd.xlane.f32.xlu1 %v28_v14 }
  0xa2   :  { %v41_v17 = vmul.f32 %v40_v15, %v20_v11 }
  0xa4   :  { %v42_v18 = vsel %vm21_vm0, %v41_v17, 0.0 }
  0xa5   :  { %37 = vadd.xlane.f32.xlu1 %v36_v16 }
  0xa9   :  { %43 = vadd.xlane.f32.xlu1 %v42_v18 }
 0x12e   :  { %v30_v19 = vpop.xlane.xlu1 %29 }
 0x12f   :  { %57 = vlog2.f32 %v30_v19 }
 0x130   :  { %59 = vrcp.f32 %v30_v19 }
 0x132   :  { %v38_v20 = vpop.xlane.xlu1 %37 }
 0x136   :  { %v44_v25 = vpop.xlane.xlu1 %43 }
 0x139   :  { %v58_v21 = vpop.eup %57 }
 0x13a   :  { %v33_v22 = vmul.f32 0.6931472, %v58_v21  ;;  %v60_v23 = vpop.eup %59 }
 0x13b   :  { %v45_v27 = vmul.f32 %v60_v23, %v44_v25 }
 0x13c   :  { %v34_v24 = vadd.f32 %v33_v22, %v24_v4 }
 0x13e   :  { %v39_v26 = vsub.f32 %v34_v24, %v38_v20 }
 0x140   :  { %v46_v28 = vadd.f32 %v45_v27, %v39_v26 }
 0x142   :  { %48 = vst.msk [vmem:[%s92_s2] sm:$0xff] %vm47_vm2, %v46_v28 }

</bundles_post_ra>
